<compile_context>
chip_gen: v5e
topology: v5e:2x2
jax: 0.10.0
libtpu: 0.0.40
codegen_flags: <defaults>
</compile_context>

<pallas_src>
import functools

import jax
import jax.numpy as jnp
from jax.experimental import pallas as pl
from jax.experimental.pallas import tpu as pltpu


def _mlp_kernel(num_layers, x_ref, *refs):
    # refs = (W0, b0, W1, b1, ..., W_{L-1}, b_{L-1}, out_ref)
    out_ref = refs[-1]
    wb = refs[:-1]
    h = x_ref[...]                               # (tile_n, input_dim) bf16
    for i in range(num_layers):
        w = wb[2 * i][...]                       # (in, out) bf16, VMEM-resident
        b = wb[2 * i + 1][...]                   # (1, out)  f32
        # bf16 MXU matmul, f32 accumulation; f32 bias add / ReLU on the VPU.
        h = jnp.dot(h, w, preferred_element_type=jnp.float32) + b
        if i < num_layers - 1:                   # hidden MLPLayer: activate=True (ReLU)
            h = jnp.maximum(h, 0.0).astype(jnp.bfloat16)
        # final MLPLayer: activate=False -> no activation
    out_ref[...] = h.astype(out_ref.dtype)


def prepare_kernel_params(weights, biases, input_dim):
    """One-time parameter massaging (split W0, cast to bf16). No output padding."""
    num_layers = len(weights)
    out_dim = weights[-1].shape[1]

    w0 = jnp.asarray(weights[0], jnp.bfloat16)
    w0_coords = w0[:input_dim]                   # (input_dim, hidden)
    w0_latent = w0[input_dim:]                   # (latent,    hidden)

    ker_weights = [w0_coords] + [jnp.asarray(w, jnp.bfloat16) for w in weights[1:]]
    ker_biases = [jnp.asarray(b, jnp.float32).reshape(1, -1) for b in biases]

    return dict(num_layers=num_layers, out_dim=out_dim,
                w0_latent=w0_latent, weights=ker_weights, biases=ker_biases)


def _pick_tile(n, tile_n):
    """Row tile: large, multiple of 128 when tiled, >=2 grid steps when possible."""
    if n <= 256:
        return n                                  # single full-extent block
    tile = min(tile_n, n)
    tile = max(128, (tile // 128) * 128)          # full-height MXU M passes
    if pl.cdiv(n, tile) < 2:                      # give both v7x TCs work
        tile = max(128, ((n // 2) // 128) * 128)
    return tile


def time_varying_mlp_forward(coords, t, latents, prepared, *, tile_n=2048,
                             out_dtype=None):
    """coords: (N, input_dim) f32; t: scalar int; latents: (T, latent_size)."""
    n, input_dim = coords.shape
    num_layers = prepared["num_layers"]
    out_dim = prepared["out_dim"]
    out_dtype = coords.dtype if out_dtype is None else out_dtype

    # Fold the (identical-for-all-rows) latent contribution into layer-0 bias:
    #   fused_b0 = latents[t] @ W0_latent + b0        -> (1, hidden)
    latent_row = jax.lax.dynamic_index_in_dim(latents, t, axis=0, keepdims=True)
    fused_b0 = jnp.dot(latent_row.astype(jnp.bfloat16), prepared["w0_latent"],
                       preferred_element_type=jnp.float32) + prepared["biases"][0]

    ker_weights = prepared["weights"]
    ker_biases = [fused_b0] + list(prepared["biases"][1:])

    tile = _pick_tile(n, tile_n)
    grid = (pl.cdiv(n, tile),)

    operands = [coords.astype(jnp.bfloat16)]      # bf16 input stream
    in_specs = [pl.BlockSpec((tile, input_dim), lambda i: (i, 0))]
    for w, b in zip(ker_weights, ker_biases):
        operands += [w, b]
        in_specs += [pl.BlockSpec(w.shape, lambda i: (0, 0)),   # VMEM-resident
                     pl.BlockSpec(b.shape, lambda i: (0, 0))]

    kernel = functools.partial(_mlp_kernel, num_layers)
    # Un-padded output: block last dim == full array extent (legal); masked
    # stores, but writeback is only out_dim columns instead of a 128-lane pad.
    return pl.pallas_call(
        kernel,
        out_shape=jax.ShapeDtypeStruct((n, out_dim), out_dtype),
        grid=grid,
        in_specs=in_specs,
        out_specs=pl.BlockSpec((tile, out_dim), lambda i: (i, 0)),
        compiler_params=pltpu.CompilerParams(
            dimension_semantics=("parallel",)),   # shards row tiles across TCs on v7x
    )(*operands)


def init_params(key, input_dim, timesteps, latent_size, hidden_dim, output_dim,
                num_layers):
    """Deterministic synthetic parameters matching the PyTorch module's shapes."""
    dims_in = [input_dim + latent_size] + [hidden_dim] * (num_layers - 1)
    dims_out = [hidden_dim] * (num_layers - 1) + [output_dim]
    keys = jax.random.split(key, 2 * num_layers + 1)
    latents = jax.random.normal(keys[0], (timesteps, latent_size), jnp.float32)
    weights, biases = [], []
    for i, (di, do) in enumerate(zip(dims_in, dims_out)):
        # nn.Linear stores (out, in); we keep the transposed (in, out) layout.
        w = jax.random.normal(keys[1 + 2 * i], (di, do), jnp.float32) * 0.1
        b = jax.random.normal(keys[2 + 2 * i], (do,), jnp.float32) * 0.1
        weights.append(w)
        biases.append(b)
    return latents, weights, biases


def _reference(coords, t, latents, weights, biases, num_layers):
    """Pure-JAX reference (same bf16-input / f32-accumulate matmuls)."""
    n = coords.shape[0]
    latent_size = latents.shape[1]
    x = jnp.concatenate(
        [coords, jnp.broadcast_to(latents[t][None, :], (n, latent_size))], axis=-1)
    h = x
    for i, (w, b) in enumerate(zip(weights, biases)):
        h = jnp.dot(h.astype(jnp.bfloat16), w.astype(jnp.bfloat16),
                    preferred_element_type=jnp.float32) + b
        if i < num_layers - 1:
            h = jnp.maximum(h, 0.0)
    return h


if __name__ == "__main__":
    # Module hyper-params (small, consistent with the forward pass).
    input_dim, timesteps, latent_size = 4, 8, 8
    hidden_dim, output_dim, num_layers = 32, 3, 3
    t = 2

    key = jax.random.PRNGKey(0)
    k_param, k_coords = jax.random.split(key)
    latents, weights, biases = init_params(
        k_param, input_dim, timesteps, latent_size, hidden_dim, output_dim,
        num_layers)
    prepared = prepare_kernel_params(weights, biases, input_dim)

    # Two point counts: multiple-of-tile (exercises the 2-step pipelined grid)
    # and a non-multiple (exercises the partial last tile / OOB-drop path).
    for n_points in (1024, 300):
        coords = jax.random.normal(
            jax.random.fold_in(k_coords, n_points), (n_points, input_dim),
            jnp.float32)
        out = time_varying_mlp_forward(coords, t, latents, prepared)
        out = jax.block_until_ready(out)

        ref = _reference(coords, t, latents, weights, biases, num_layers)
        assert out.shape == (n_points, output_dim), out.shape
        assert jnp.allclose(out, ref, atol=2e-2, rtol=2e-2), (
            n_points, float(jnp.max(jnp.abs(out - ref))))

    print("KERNEL_OK")
</pallas_src>

<mosaic_0001>
module attributes {stable_mosaic.version = 11 : i64} {
  func.func @_mlp_kernel(%arg0: i32, %arg1: memref<512x4xbf16, #tpu.memory_space<vmem>>, %arg2: memref<4x32xbf16, #tpu.memory_space<vmem>>, %arg3: memref<1x32xf32, #tpu.memory_space<vmem>>, %arg4: memref<32x32xbf16, #tpu.memory_space<vmem>>, %arg5: memref<1x32xf32, #tpu.memory_space<vmem>>, %arg6: memref<32x3xbf16, #tpu.memory_space<vmem>>, %arg7: memref<1x3xf32, #tpu.memory_space<vmem>>, %arg8: memref<512x3xf32, #tpu.memory_space<vmem>>) attributes {dimension_semantics = [#tpu.dimension_semantics<parallel>], iteration_bounds = array<i64: 2>, scalar_prefetch = 0 : i64, scratch_operands = 0 : i64, tpu.core_type = #tpu.core_type<tc>, window_params = [{transform_indices = @transform_0, window_bounds = array<i64: 512, 4>}, {pipeline_mode = #tpu.pipeline_mode<synchronous>, transform_indices = @transform_1, window_bounds = array<i64: 4, 32>}, {pipeline_mode = #tpu.pipeline_mode<synchronous>, transform_indices = @transform_2, window_bounds = array<i64: 1, 32>}, {pipeline_mode = #tpu.pipeline_mode<synchronous>, transform_indices = @transform_3, window_bounds = array<i64: 32, 32>}, {pipeline_mode = #tpu.pipeline_mode<synchronous>, transform_indices = @transform_4, window_bounds = array<i64: 1, 32>}, {pipeline_mode = #tpu.pipeline_mode<synchronous>, transform_indices = @transform_5, window_bounds = array<i64: 32, 3>}, {pipeline_mode = #tpu.pipeline_mode<synchronous>, transform_indices = @transform_6, window_bounds = array<i64: 1, 3>}, {transform_indices = @transform_7, window_bounds = array<i64: 512, 3>}]} {
    %c0 = arith.constant 0 : index
    %c0_0 = arith.constant 0 : index
    %0 = vector.load %arg1[%c0, %c0_0] : memref<512x4xbf16, #tpu.memory_space<vmem>>, vector<512x4xbf16>
    %c0_1 = arith.constant 0 : index
    %c0_2 = arith.constant 0 : index
    %1 = vector.load %arg2[%c0_1, %c0_2] : memref<4x32xbf16, #tpu.memory_space<vmem>>, vector<4x32xbf16>
    %c0_3 = arith.constant 0 : index
    %c0_4 = arith.constant 0 : index
    %2 = vector.load %arg3[%c0_3, %c0_4] : memref<1x32xf32, #tpu.memory_space<vmem>>, vector<1x32xf32>
    %cst = arith.constant dense<0.000000e+00> : vector<512x32xf32>
    %3 = tpu.matmul %0, %1, %cst {dimension_numbers = #tpu.dot_dimension_numbers<[1], [0], [0], [1], [0, 0, 1, 1], [], []>} : vector<512x4xbf16>, vector<4x32xbf16>, vector<512x32xf32> -> vector<512x32xf32>
    %4 = vector.broadcast %2 : vector<1x32xf32> to vector<512x32xf32>
    %5 = arith.addf %3, %4 : vector<512x32xf32>
    %cst_5 = arith.constant 0.000000e+00 : f32
    %6 = vector.broadcast %cst_5 : f32 to vector<512x32xf32>
    %7 = arith.maximumf %5, %6 : vector<512x32xf32>
    %8 = arith.truncf %7 : vector<512x32xf32> to vector<512x32xbf16>
    %c0_6 = arith.constant 0 : index
    %c0_7 = arith.constant 0 : index
    %9 = vector.load %arg4[%c0_6, %c0_7] : memref<32x32xbf16, #tpu.memory_space<vmem>>, vector<32x32xbf16>
    %c0_8 = arith.constant 0 : index
    %c0_9 = arith.constant 0 : index
    %10 = vector.load %arg5[%c0_8, %c0_9] : memref<1x32xf32, #tpu.memory_space<vmem>>, vector<1x32xf32>
    %cst_10 = arith.constant dense<0.000000e+00> : vector<512x32xf32>
    %11 = tpu.matmul %8, %9, %cst_10 {dimension_numbers = #tpu.dot_dimension_numbers<[1], [0], [0], [1], [0, 0, 1, 1], [], []>} : vector<512x32xbf16>, vector<32x32xbf16>, vector<512x32xf32> -> vector<512x32xf32>
    %12 = vector.broadcast %10 : vector<1x32xf32> to vector<512x32xf32>
    %13 = arith.addf %11, %12 : vector<512x32xf32>
    %cst_11 = arith.constant 0.000000e+00 : f32
    %14 = vector.broadcast %cst_11 : f32 to vector<512x32xf32>
    %15 = arith.maximumf %13, %14 : vector<512x32xf32>
    %16 = arith.truncf %15 : vector<512x32xf32> to vector<512x32xbf16>
    %c0_12 = arith.constant 0 : index
    %c0_13 = arith.constant 0 : index
    %17 = vector.load %arg6[%c0_12, %c0_13] : memref<32x3xbf16, #tpu.memory_space<vmem>>, vector<32x3xbf16>
    %c0_14 = arith.constant 0 : index
    %c0_15 = arith.constant 0 : index
    %18 = vector.load %arg7[%c0_14, %c0_15] : memref<1x3xf32, #tpu.memory_space<vmem>>, vector<1x3xf32>
    %cst_16 = arith.constant dense<0.000000e+00> : vector<512x3xf32>
    %19 = tpu.matmul %16, %17, %cst_16 {dimension_numbers = #tpu.dot_dimension_numbers<[1], [0], [0], [1], [0, 0, 1, 1], [], []>} : vector<512x32xbf16>, vector<32x3xbf16>, vector<512x3xf32> -> vector<512x3xf32>
    %20 = vector.broadcast %18 : vector<1x3xf32> to vector<512x3xf32>
    %21 = arith.addf %19, %20 : vector<512x3xf32>
    %c0_17 = arith.constant 0 : index
    %c0_18 = arith.constant 0 : index
    %22 = vector.load %arg8[%c0_17, %c0_18] : memref<512x3xf32, #tpu.memory_space<vmem>>, vector<512x3xf32>
    tpu.vector_store %arg8[%c0_17, %c0_18], %21 {strides = array<i32>} : memref<512x3xf32, #tpu.memory_space<vmem>>, vector<512x3xf32>,
    return
  }
  func.func @transform_0(%arg0: i32) -> (i32, i32) {
    %c0_i32 = arith.constant 0 : i32
    %c0_i32_0 = arith.constant 0 : i32
    return %arg0, %c0_i32 : i32, i32
  }
  func.func @transform_1(%arg0: i32) -> (i32, i32) {
    %c0_i32 = arith.constant 0 : i32
    %c0_i32_0 = arith.constant 0 : i32
    %c0_i32_1 = arith.constant 0 : i32
    return %c0_i32, %c0_i32_0 : i32, i32
  }
  func.func @transform_2(%arg0: i32) -> (i32, i32) {
    %c0_i32 = arith.constant 0 : i32
    %c0_i32_0 = arith.constant 0 : i32
    %c0_i32_1 = arith.constant 0 : i32
    return %c0_i32, %c0_i32_0 : i32, i32
  }
  func.func @transform_3(%arg0: i32) -> (i32, i32) {
    %c0_i32 = arith.constant 0 : i32
    %c0_i32_0 = arith.constant 0 : i32
    %c0_i32_1 = arith.constant 0 : i32
    return %c0_i32, %c0_i32_0 : i32, i32
  }
  func.func @transform_4(%arg0: i32) -> (i32, i32) {
    %c0_i32 = arith.constant 0 : i32
    %c0_i32_0 = arith.constant 0 : i32
    %c0_i32_1 = arith.constant 0 : i32
    return %c0_i32, %c0_i32_0 : i32, i32
  }
  func.func @transform_5(%arg0: i32) -> (i32, i32) {
    %c0_i32 = arith.constant 0 : i32
    %c0_i32_0 = arith.constant 0 : i32
    %c0_i32_1 = arith.constant 0 : i32
    return %c0_i32, %c0_i32_0 : i32, i32
  }
  func.func @transform_6(%arg0: i32) -> (i32, i32) {
    %c0_i32 = arith.constant 0 : i32
    %c0_i32_0 = arith.constant 0 : i32
    %c0_i32_1 = arith.constant 0 : i32
    return %c0_i32, %c0_i32_0 : i32, i32
  }
  func.func @transform_7(%arg0: i32) -> (i32, i32) {
    %c0_i32 = arith.constant 0 : i32
    %c0_i32_0 = arith.constant 0 : i32
    return %arg0, %c0_i32 : i32, i32
  }
}

</mosaic_0001>

<bundles_post_ra>
// kernel: tpu_custom_call.1
= control target key start
LH: loop header
LB: loop body
LE: loop exit
PB: predicated region body
PF: predicated region fallthrough
CT: control target
= control target key end

     0   :  { %s2019_s24 = smov 0   ;;  %s2532_s0 = inlined_call_operand.vmem [shape: bf16[1024,4], index: 0, kind: input, shape index: {}]   ;;  %s2533_s1 = inlined_call_operand.vmem [shape: bf16[4,32], index: 1, kind: input, shape index: {}]   ;;  %s2534_s2 = inlined_call_operand.vmem [shape: f32[1,32], index: 2, kind: input, shape index: {}]   ;;  %s2535_s3 = inlined_call_operand.vmem [shape: bf16[32,32], index: 3, kind: input, shape index: {}]   ;;  %s2536_s4 = inlined_call_operand.vmem [shape: f32[1,32], index: 4, kind: input, shape index: {}]   ;;  %s2537_s5 = inlined_call_operand.vmem [shape: bf16[32,3], index: 5, kind: input, shape index: {}]   ;;  %s2538_s6 = inlined_call_operand.vmem [shape: f32[1,3], index: 6, kind: input, shape index: {}]   ;;  %s2539_s7 = inlined_call_operand.vmem [shape: f32[1024,3], index: 7, kind: output, shape index: {}]  }
   0x1 LB: > { %s1666_s25 = sadd.s32 4294967295, %s1977_s24   ;;  %p1670_p0 = scmp.ge.s32.totalorder %s1977_s24, 1  ;;  %s1977_s24 = sphi %s2019_s24, %s17_s24  }
   0x2   : > { %p238_p1 = scmp.lt.s32.totalorder %s1977_s24, 3 }
   0x4   : > { %p239_p2 = pnand %p1670_p0, %p238_p1 }
   0x5   : > { %s1671_s28 = sshll.u32 (!%p239_p2), %s1666_s25, 6 }
   0x6   : > { %242 = sbr.rel (%p239_p2) target bundleno = 941 (0x3ad), region = 48  ;;  %p271_p3 = scmp.lt.s32.totalorder (!%p239_p2), %s1671_s28, 127 }
   0xb   : > { %v347_v0 = vld [vmem:[%s2533_s1] sm:$0x3]  ;;  %vm609_vm0 = vcmask 1041408   ;;  %s2541_s28 = smov (!%p271_p3, %s1671_s28), 127  ;;  %vm512_vm1 = vcmask 31744   ;;  %v1950_v9 = vld [vmem:[%s2535_s3 + $0x8] sm:$0xff] }
   0xc   : > { %v611_v1 = vsel %vm609_vm0, %v347_v0, 0  ;;  %s1672_s29 = sshll.u32 %s2541_s28, 2  ;;  %1001 = vmatpush.bf16.msra.mxu1 %v1950_v9  ;;  %v1949_v10 = vld [vmem:[%s2535_s3] sm:$0xff]  ;;  %vm898_vm2 = vcmask 261120   ;;  %s1674_s22 = sshll.u32 %s2541_s28, 3  ;;  %vm1545_vm3 = vcmask 23552  }
   0xd   : > { %620 = vmatpush.bf16.msra.mxu0 %v611_v1  ;;  %1953 = vmatpush.bf16.msra.mxu3 %v611_v1  ;;  %s2036_s9 = scalar_lea.vmem %s2532_s0, %s1672_s29  ;;  %v2064_v14 = vld [vmem:[%s2534_s2] ss:$0 sm:$0xff]  ;;  %s2215_s29 = scalar_lea.vmem %s2539_s7, %s1674_s22 }
   0xe   : > { %v1917_v2 = vld [vmem:[%s2036_s9] sm:$0xff]  ;;  %v1918_v3 = vld [vmem:[%s2036_s9 + $0x8] sm:$0xff]  ;;  %v1919_v4 = vld [vmem:[%s2036_s9 + $0x10] sm:$0xff] }
   0xf   : > { %v1920_v5 = vld [vmem:[%s2036_s9 + $0x18] sm:$0xff]  ;;  %v1921_v6 = vld [vmem:[%s2036_s9 + $0x20] sm:$0xff]  ;;  %v1922_v7 = vld [vmem:[%s2036_s9 + $0x28] sm:$0xff] }
  0x10   : > { %1803 = vmatmul.msk.bf16.vlgmr.msra.gmra.mxu0 %vm512_vm1, %v1917_v2  ;;  %v1923_v8 = vld [vmem:[%s2036_s9 + $0x30] sm:$0xff]  ;;  %1002 = vmatpush.bf16.msra.mxu1 %v1949_v10  ;;  %v1924_v11 = vld [vmem:[%s2036_s9 + $0x38] sm:$0xff]  ;;  %v1925_v12 = vld [vmem:[%s2036_s9 + $0x40] sm:$0xff] }
  0x11   : > { %1954 = vmatpush.bf16.msrb.mxu3 %v1950_v9  ;;  %v1926_v21 = vld [vmem:[%s2036_s9 + $0x48] sm:$0xff]  ;;  %v1927_v29 = vld [vmem:[%s2036_s9 + $0x50] sm:$0xff]  ;;  %v1928_v37 = vld [vmem:[%s2036_s9 + $0x58] sm:$0xff] }
  0x12   : > { %v1929_v45 = vld [vmem:[%s2036_s9 + $0x60] sm:$0xff]  ;;  %v1930_v53 = vld [vmem:[%s2036_s9 + $0x68] sm:$0xff]  ;;  %v1931_v61 = vld [vmem:[%s2036_s9 + $0x70] sm:$0xff] }
  0x15   : > { %1955 = vmatpush.bf16.msrb.mxu3 %v1949_v10 }
  0x20   : > { %1804 = vmatmul.msk.bf16.gmra.mxu0 %vm512_vm1, %v1918_v3 }
  0x30   : > { %1805 = vmatmul.msk.bf16.gmra.mxu0 %vm512_vm1, %v1919_v4 }
  0x40   : > { %1806 = vmatmul.msk.bf16.gmra.mxu0 %vm512_vm1, %v1920_v5  ;;  %v1932_v5 = vld [vmem:[%s2036_s9 + $0x78] sm:$0xff] }
  0x50   : > { %1807 = vmatmul.msk.bf16.gmra.mxu0 %vm512_vm1, %v1921_v6 }
  0x60   : > { %1808 = vmatmul.msk.bf16.gmra.mxu0 %vm512_vm1, %v1922_v7  ;;  %v2104_v7 = vld [vmem:[%s2537_s5 + $0x8] sm:$0xff] }
  0x61   : > { %1382 = vmatpush.bf16.msra.mxu2 %v2104_v7 }
  0x70   : > { %1809 = vmatmul.msk.bf16.gmra.mxu0 %vm512_vm1, %v1923_v8  ;;  %v2111_v8 = vld [vmem:[%s2537_s5] sm:$0xff] }
  0x71   : > { %1383 = vmatpush.bf16.msra.mxu2 %v2111_v8 }
  0x80   : > { %1810 = vmatmul.msk.bf16.gmra.mxu0 %vm512_vm1, %v1924_v11 }
  0x8d   : > { %v622_v13 = vpop.f32.mrf.mxu0 }
  0x8e   : > { %v623_v15 = vadd.f32 %v2064_v14, %v622_v13 }
  0x90   : > { %1811 = vmatmul.msk.bf16.gmra.mxu0 %vm512_vm1, %v1925_v12  ;;  %v782_v18 = vmax.f32 %v623_v15, 0.0 }
  0x95   : > { %v624_v16 = vpop.f32.mrf.mxu0 }
  0x96   : > { %v625_v17 = vadd.f32 %v2064_v14, %v624_v16  ;;  %v1933_v16 = vld [vmem:[%s2036_s9 + $0x80] sm:$0xff] }
  0x98   : > { %v783_v19 = vmax.f32 %v625_v17, 0.0 }
  0x9a   : > { %v846_v20 = vpack.c.bf16 %v783_v19, %v782_v18 }
  0x9c   : > { %1843 = vmatmul.msk.bf16.vlgmr.msra.gmra.mxu1 %vm898_vm2, %v846_v20 }
  0x9d   : > { %v627_v22 = vpop.f32.mrf.mxu0 }
  0x9e   : > { %v628_v23 = vadd.f32 %v2064_v14, %v627_v22 }
  0xa0   : > { %1812 = vmatmul.msk.bf16.gmra.mxu0 %vm512_vm1, %v1926_v21  ;;  %v784_v26 = vmax.f32 %v628_v23, 0.0 }
  0xa5   : > { %v629_v24 = vpop.f32.mrf.mxu0 }
  0xa6   : > { %v630_v25 = vadd.f32 %v2064_v14, %v629_v24 }
  0xa8   : > { %v785_v27 = vmax.f32 %v630_v25, 0.0  ;;  %v2124_v25 = vld [vmem:[%s2536_s4] ss:$0 sm:$0xff] }
  0xaa   : > { %v847_v28 = vpack.c.bf16 %v785_v27, %v784_v26  ;;  %v1934_v26 = vld [vmem:[%s2036_s9 + $0x88] sm:$0xff] }
  0xac   : > { %1844 = vmatmul.msk.bf16.gmra.mxu1 %vm898_vm2, %v847_v28 }
  0xad   : > { %v632_v30 = vpop.f32.mrf.mxu0 }
  0xae   : > { %v633_v31 = vadd.f32 %v2064_v14, %v632_v30 }
  0xb0   : > { %1813 = vmatmul.msk.bf16.gmra.mxu0 %vm512_vm1, %v1927_v29  ;;  %v786_v34 = vmax.f32 %v633_v31, 0.0 }
  0xb5   : > { %v634_v32 = vpop.f32.mrf.mxu0 }
  0xb6   : > { %v635_v33 = vadd.f32 %v2064_v14, %v634_v32 }
  0xb8   : > { %v787_v35 = vmax.f32 %v635_v33, 0.0 }
  0xba   : > { %v848_v36 = vpack.c.bf16 %v787_v35, %v786_v34 }
  0xbc   : > { %1845 = vmatmul.msk.bf16.gmra.mxu1 %vm898_vm2, %v848_v36 }
  0xbd   : > { %v637_v38 = vpop.f32.mrf.mxu0 }
  0xbe   : > { %v638_v39 = vadd.f32 %v2064_v14, %v637_v38 }
  0xc0   : > { %1814 = vmatmul.msk.bf16.gmra.mxu0 %vm512_vm1, %v1928_v37  ;;  %v788_v42 = vmax.f32 %v638_v39, 0.0 }
  0xc5   : > { %v639_v40 = vpop.f32.mrf.mxu0 }
  0xc6   : > { %v640_v41 = vadd.f32 %v2064_v14, %v639_v40 }
  0xc8   : > { %v789_v43 = vmax.f32 %v640_v41, 0.0  ;;  %v1935_v41 = vld [vmem:[%s2036_s9 + $0x90] sm:$0xff] }
  0xca   : > { %v849_v44 = vpack.c.bf16 %v789_v43, %v788_v42 }
  0xcc   : > { %1846 = vmatmul.msk.bf16.gmra.mxu1 %vm898_vm2, %v849_v44 }
  0xcd   : > { %v642_v46 = vpop.f32.mrf.mxu0 }
  0xce   : > { %v643_v47 = vadd.f32 %v2064_v14, %v642_v46 }
  0xd0   : > { %1815 = vmatmul.msk.bf16.gmra.mxu0 %vm512_vm1, %v1929_v45  ;;  %v790_v50 = vmax.f32 %v643_v47, 0.0 }
  0xd5   : > { %v644_v48 = vpop.f32.mrf.mxu0 }
  0xd6   : > { %v645_v49 = vadd.f32 %v2064_v14, %v644_v48 }
  0xd8   : > { %v791_v51 = vmax.f32 %v645_v49, 0.0 }
  0xda   : > { %v850_v52 = vpack.c.bf16 %v791_v51, %v790_v50 }
  0xdc   : > { %1847 = vmatmul.msk.bf16.gmra.mxu1 %vm898_vm2, %v850_v52 }
  0xdd   : > { %v647_v54 = vpop.f32.mrf.mxu0 }
  0xde   : > { %v648_v55 = vadd.f32 %v2064_v14, %v647_v54 }
  0xe0   : > { %1816 = vmatmul.msk.bf16.gmra.mxu0 %vm512_vm1, %v1930_v53  ;;  %v792_v58 = vmax.f32 %v648_v55, 0.0 }
  0xe5   : > { %v649_v56 = vpop.f32.mrf.mxu0 }
  0xe6   : > { %v650_v57 = vadd.f32 %v2064_v14, %v649_v56  ;;  %v1936_v56 = vld [vmem:[%s2036_s9 + $0x98] sm:$0xff] }
  0xe8   : > { %v793_v59 = vmax.f32 %v650_v57, 0.0 }
  0xea   : > { %v851_v60 = vpack.c.bf16 %v793_v59, %v792_v58 }
  0xec   : > { %1848 = vmatmul.msk.bf16.gmra.mxu1 %vm898_vm2, %v851_v60 }
  0xed   : > { %v652_v62 = vpop.f32.mrf.mxu0 }
  0xee   : > { %v653_v63 = vadd.f32 %v2064_v14, %v652_v62 }
  0xf0   : > { %1817 = vmatmul.msk.bf16.gmra.mxu0 %vm512_vm1, %v1931_v61  ;;  %v794_v2 = vmax.f32 %v653_v63, 0.0 }
  0xf5   : > { %v654_v0 = vpop.f32.mrf.mxu0 }
  0xf6   : > { %v655_v1 = vadd.f32 %v2064_v14, %v654_v0 }
  0xf8   : > { %v795_v3 = vmax.f32 %v655_v1, 0.0 }
  0xfa   : > { %v852_v4 = vpack.c.bf16 %v795_v3, %v794_v2 }
  0xfc   : > { %1849 = vmatmul.msk.bf16.gmra.mxu1 %vm898_vm2, %v852_v4 }
  0xfd   : > { %v657_v6 = vpop.f32.mrf.mxu0 }
  0xfe   : > { %v658_v9 = vadd.f32 %v2064_v14, %v657_v6 }
 0x100   : > { %1818 = vmatmul.msk.bf16.gmra.mxu0 %vm512_vm1, %v1932_v5  ;;  %v796_v12 = vmax.f32 %v658_v9, 0.0  ;;  %v1937_v9 = vld [vmem:[%s2036_s9 + $0xa0] sm:$0xff] }
 0x105   : > { %v659_v10 = vpop.f32.mrf.mxu0 }
 0x106   : > { %v660_v11 = vadd.f32 %v2064_v14, %v659_v10 }
 0x108   : > { %v797_v13 = vmax.f32 %v660_v11, 0.0 }
 0x10a   : > { %v853_v15 = vpack.c.bf16 %v797_v13, %v796_v12 }
 0x10c   : > { %1850 = vmatmul.msk.bf16.gmra.mxu1 %vm898_vm2, %v853_v15 }
 0x10d   : > { %v662_v17 = vpop.f32.mrf.mxu0 }
 0x10e   : > { %v663_v18 = vadd.f32 %v2064_v14, %v662_v17 }
 0x110   : > { %1819 = vmatmul.msk.bf16.gmra.mxu0 %vm512_vm1, %v1933_v16  ;;  %v798_v21 = vmax.f32 %v663_v18, 0.0 }
 0x115   : > { %v664_v19 = vpop.f32.mrf.mxu0 }
 0x116   : > { %v665_v20 = vadd.f32 %v2064_v14, %v664_v19 }
 0x118   : > { %v799_v22 = vmax.f32 %v665_v20, 0.0 }
 0x119   : > { %v1004_v23 = vpop.f32.mrf.mxu1 }
 0x11a   : > { %v854_v24 = vpack.c.bf16 %v799_v22, %v798_v21  ;;  %v1005_v28 = vadd.f32 %v2124_v25, %v1004_v23 }
 0x11c   : > { %1851 = vmatmul.msk.bf16.gmra.mxu1 %vm898_vm2, %v854_v24  ;;  %v1164_v31 = vmax.f32 %v1005_v28, 0.0 }
 0x11d   : > { %v667_v27 = vpop.f32.mrf.mxu0 }
 0x11e   : > { %v668_v32 = vadd.f32 %v2064_v14, %v667_v27 }
 0x120   : > { %1820 = vmatmul.msk.bf16.gmra.mxu0 %vm512_vm1, %v1934_v26  ;;  %v800_v37 = vmax.f32 %v668_v32, 0.0  ;;  %v1938_v26 = vld [vmem:[%s2036_s9 + $0xa8] sm:$0xff] }
 0x121   : > { %v1006_v29 = vpop.f32.mrf.mxu1 }
 0x122   : > { %v1007_v30 = vadd.f32 %v2124_v25, %v1006_v29 }
 0x124   : > { %v1165_v33 = vmax.f32 %v1007_v30, 0.0 }
 0x125   : > { %v669_v34 = vpop.f32.mrf.mxu0 }
 0x126   : > { %v670_v35 = vadd.f32 %v2064_v14, %v669_v34  ;;  %v1228_v36 = vpack.c.bf16 %v1165_v33, %v1164_v31 }
 0x128   : > { %v801_v38 = vmax.f32 %v670_v35, 0.0  ;;  %1883 = vmatmul.msk.bf16.vlgmr.msra.gmra.mxu2 %vm898_vm2, %v1228_v36 }
 0x129   : > { %v1009_v39 = vpop.f32.mrf.mxu1 }
 0x12a   : > { %v855_v40 = vpack.c.bf16 %v801_v38, %v800_v37  ;;  %v1010_v43 = vadd.f32 %v2124_v25, %v1009_v39 }
 0x12c   : > { %1852 = vmatmul.msk.bf16.gmra.mxu1 %vm898_vm2, %v855_v40  ;;  %v1166_v46 = vmax.f32 %v1010_v43, 0.0 }
 0x12d   : > { %v672_v42 = vpop.f32.mrf.mxu0 }
 0x12e   : > { %v673_v47 = vadd.f32 %v2064_v14, %v672_v42 }
 0x130   : > { %1821 = vmatmul.msk.bf16.gmra.mxu0 %vm512_vm1, %v1935_v41  ;;  %v802_v52 = vmax.f32 %v673_v47, 0.0  ;;  %v1939_v41 = vld [vmem:[%s2036_s9 + $0xb0] sm:$0xff] }
 0x131   : > { %v1011_v44 = vpop.f32.mrf.mxu1 }
 0x132   : > { %v1012_v45 = vadd.f32 %v2124_v25, %v1011_v44  ;;  %v1942_v44 = vld [vmem:[%s2036_s9 + $0xc8] sm:$0xff] }
 0x133   : > { %1828 = vmatmul.msk.bf16.vlgmr.msra.gmra.mxu3 %vm512_vm1, %v1942_v44 }
 0x134   : > { %v1167_v48 = vmax.f32 %v1012_v45, 0.0  ;;  %1956 = vmatpush.bf16.msra.mxu3 %v2104_v7  ;;  %v1940_v7 = vld [vmem:[%s2036_s9 + $0xb8] sm:$0xff] }
 0x135   : > { %v674_v49 = vpop.f32.mrf.mxu0 }
 0x136   : > { %v675_v50 = vadd.f32 %v2064_v14, %v674_v49  ;;  %v1229_v51 = vpack.c.bf16 %v1167_v48, %v1166_v46 }
 0x138   : > { %v803_v53 = vmax.f32 %v675_v50, 0.0  ;;  %1884 = vmatmul.msk.bf16.gmra.mxu2 %vm898_vm2, %v1229_v51  ;;  %1957 = vmatpush.bf16.msra.mxu3 %v2111_v8 }
 0x139   : > { %v1014_v54 = vpop.f32.mrf.mxu1 }
 0x13a   : > { %v856_v55 = vpack.c.bf16 %v803_v53, %v802_v52  ;;  %v1015_v58 = vadd.f32 %v2124_v25, %v1014_v54 }
 0x13c   : > { %1853 = vmatmul.msk.bf16.gmra.mxu1 %vm898_vm2, %v856_v55  ;;  %v1168_v61 = vmax.f32 %v1015_v58, 0.0 }
 0x13d   : > { %v677_v57 = vpop.f32.mrf.mxu0 }
 0x13e   : > { %v678_v62 = vadd.f32 %v2064_v14, %v677_v57 }
 0x140   : > { %1822 = vmatmul.msk.bf16.gmra.mxu0 %vm512_vm1, %v1936_v56  ;;  %v804_v3 = vmax.f32 %v678_v62, 0.0 }
 0x141   : > { %v1016_v59 = vpop.f32.mrf.mxu1 }
 0x142   : > { %v1017_v60 = vadd.f32 %v2124_v25, %v1016_v59  ;;  %v1943_v59 = vld [vmem:[%s2036_s9 + $0xd0] sm:$0xff] }
 0x143   : > { %1829 = vmatmul.msk.bf16.gmra.mxu3 %vm512_vm1, %v1943_v59 }
 0x144   : > { %v1169_v63 = vmax.f32 %v1017_v60, 0.0 }
 0x145   : > { %v679_v0 = vpop.f32.mrf.mxu0 }
 0x146   : > { %v680_v1 = vadd.f32 %v2064_v14, %v679_v0  ;;  %v1230_v2 = vpack.c.bf16 %v1169_v63, %v1168_v61 }
 0x148   : > { %v805_v4 = vmax.f32 %v680_v1, 0.0  ;;  %1885 = vmatmul.msk.bf16.gmra.mxu2 %vm898_vm2, %v1230_v2 }
 0x149   : > { %v1019_v5 = vpop.f32.mrf.mxu1 }
 0x14a   : > { %v857_v6 = vpack.c.bf16 %v805_v4, %v804_v3  ;;  %v1020_v11 = vadd.f32 %v2124_v25, %v1019_v5 }
 0x14c   : > { %1854 = vmatmul.msk.bf16.gmra.mxu1 %vm898_vm2, %v857_v6  ;;  %v1170_v15 = vmax.f32 %v1020_v11, 0.0 }
 0x14d   : > { %v682_v10 = vpop.f32.mrf.mxu0 }
 0x14e   : > { %v683_v16 = vadd.f32 %v2064_v14, %v682_v10 }
 0x150   : > { %1823 = vmatmul.msk.bf16.gmra.mxu0 %vm512_vm1, %v1937_v9  ;;  %v806_v21 = vmax.f32 %v683_v16, 0.0  ;;  %v1941_v9 = vld [vmem:[%s2036_s9 + $0xc0] sm:$0xff] }
 0x151   : > { %v1021_v12 = vpop.f32.mrf.mxu1 }
 0x152   : > { %v1022_v13 = vadd.f32 %v2124_v25, %v1021_v12  ;;  %v1944_v12 = vld [vmem:[%s2036_s9 + $0xd8] sm:$0xff] }
 0x153   : > { %1830 = vmatmul.msk.bf16.gmra.mxu3 %vm512_vm1, %v1944_v12 }
 0x154   : > { %v1171_v17 = vmax.f32 %v1022_v13, 0.0 }
 0x155   : > { %v684_v18 = vpop.f32.mrf.mxu0 }
 0x156   : > { %v685_v19 = vadd.f32 %v2064_v14, %v684_v18  ;;  %v1231_v20 = vpack.c.bf16 %v1171_v17, %v1170_v15 }
 0x158   : > { %v807_v22 = vmax.f32 %v685_v19, 0.0  ;;  %1886 = vmatmul.msk.bf16.gmra.mxu2 %vm898_vm2, %v1231_v20 }
 0x159   : > { %v1024_v23 = vpop.f32.mrf.mxu1 }
 0x15a   : > { %v858_v24 = vpack.c.bf16 %v807_v22, %v806_v21  ;;  %v1025_v28 = vadd.f32 %v2124_v25, %v1024_v23 }
 0x15c   : > { %1855 = vmatmul.msk.bf16.gmra.mxu1 %vm898_vm2, %v858_v24  ;;  %v1172_v31 = vmax.f32 %v1025_v28, 0.0 }
 0x15d   : > { %v687_v27 = vpop.f32.mrf.mxu0 }
 0x15e   : > { %v688_v32 = vadd.f32 %v2064_v14, %v687_v27 }
 0x160   : > { %1824 = vmatmul.msk.bf16.gmra.mxu0 %vm512_vm1, %v1938_v26  ;;  %v808_v37 = vmax.f32 %v688_v32, 0.0 }
 0x161   : > { %v1026_v29 = vpop.f32.mrf.mxu1 }
 0x162   : > { %v1027_v30 = vadd.f32 %v2124_v25, %v1026_v29  ;;  %v1945_v29 = vld [vmem:[%s2036_s9 + $0xe0] sm:$0xff] }
 0x163   : > { %1831 = vmatmul.msk.bf16.gmra.mxu3 %vm512_vm1, %v1945_v29 }
 0x164   : > { %v1173_v33 = vmax.f32 %v1027_v30, 0.0 }
 0x165   : > { %v689_v34 = vpop.f32.mrf.mxu0 }
 0x166   : > { %v690_v35 = vadd.f32 %v2064_v14, %v689_v34  ;;  %v1232_v36 = vpack.c.bf16 %v1173_v33, %v1172_v31 }
 0x168   : > { %v809_v38 = vmax.f32 %v690_v35, 0.0  ;;  %1887 = vmatmul.msk.bf16.gmra.mxu2 %vm898_vm2, %v1232_v36 }
 0x169   : > { %v1029_v39 = vpop.f32.mrf.mxu1 }
 0x16a   : > { %v859_v40 = vpack.c.bf16 %v809_v38, %v808_v37  ;;  %v1030_v43 = vadd.f32 %v2124_v25, %v1029_v39 }
 0x16c   : > { %1856 = vmatmul.msk.bf16.gmra.mxu1 %vm898_vm2, %v859_v40  ;;  %v1174_v47 = vmax.f32 %v1030_v43, 0.0  ;;  %v2210_v40 = vld [vmem:[%s2538_s6] ss:$0 sm:$0xff] }
 0x16d   : > { %v692_v42 = vpop.f32.mrf.mxu0 }
 0x16e   : > { %v693_v48 = vadd.f32 %v2064_v14, %v692_v42 }
 0x170   : > { %1825 = vmatmul.msk.bf16.gmra.mxu0 %vm512_vm1, %v1939_v41  ;;  %v810_v53 = vmax.f32 %v693_v48, 0.0 }
 0x171   : > { %v1031_v45 = vpop.f32.mrf.mxu1 }
 0x172   : > { %v1032_v46 = vadd.f32 %v2124_v25, %v1031_v45 }
 0x174   : > { %v1175_v49 = vmax.f32 %v1032_v46, 0.0 }
 0x175   : > { %v694_v50 = vpop.f32.mrf.mxu0 }
 0x176   : > { %v695_v51 = vadd.f32 %v2064_v14, %v694_v50  ;;  %v1233_v52 = vpack.c.bf16 %v1175_v49, %v1174_v47  ;;  %v1946_v47 = vld [vmem:[%s2036_s9 + $0xe8] sm:$0xff] }
 0x177   : > { %1832 = vmatmul.msk.bf16.gmra.mxu3 %vm512_vm1, %v1946_v47 }
 0x178   : > { %v811_v54 = vmax.f32 %v695_v51, 0.0  ;;  %1888 = vmatmul.msk.bf16.gmra.mxu2 %vm898_vm2, %v1233_v52 }
 0x179   : > { %v1034_v55 = vpop.f32.mrf.mxu1 }
 0x17a   : > { %v860_v56 = vpack.c.bf16 %v811_v54, %v810_v53  ;;  %v1035_v58 = vadd.f32 %v2124_v25, %v1034_v55 }
 0x17c   : > { %1857 = vmatmul.msk.bf16.gmra.mxu1 %vm898_vm2, %v860_v56  ;;  %v1176_v8 = vmax.f32 %v1035_v58, 0.0 }
 0x17d   : > { %v697_v57 = vpop.f32.mrf.mxu0 }
 0x17e   : > { %v698_v62 = vadd.f32 %v2064_v14, %v697_v57 }
 0x180   : > { %1826 = vmatmul.msk.bf16.gmra.mxu0 %vm512_vm1, %v1940_v7  ;;  %v812_v3 = vmax.f32 %v698_v62, 0.0 }
 0x181   : > { %v1036_v60 = vpop.f32.mrf.mxu1 }
 0x182   : > { %v1037_v61 = vadd.f32 %v2124_v25, %v1036_v60 }
 0x184   : > { %v1177_v63 = vmax.f32 %v1037_v61, 0.0 }
 0x185   : > { %v699_v0 = vpop.f32.mrf.mxu0 }
 0x186   : > { %v700_v1 = vadd.f32 %v2064_v14, %v699_v0  ;;  %v1234_v2 = vpack.c.bf16 %v1177_v63, %v1176_v8  ;;  %v1947_v0 = vld [vmem:[%s2036_s9 + $0xf0] sm:$0xff] }
 0x187   : > { %1833 = vmatmul.msk.bf16.gmra.mxu3 %vm512_vm1, %v1947_v0 }
 0x188   : > { %v813_v4 = vmax.f32 %v700_v1, 0.0  ;;  %1889 = vmatmul.msk.bf16.gmra.mxu2 %vm898_vm2, %v1234_v2 }
 0x189   : > { %v1039_v5 = vpop.f32.mrf.mxu1 }
 0x18a   : > { %v861_v6 = vpack.c.bf16 %v813_v4, %v812_v3  ;;  %v1040_v11 = vadd.f32 %v2124_v25, %v1039_v5 }
 0x18c   : > { %1858 = vmatmul.msk.bf16.gmra.mxu1 %vm898_vm2, %v861_v6  ;;  %v1178_v16 = vmax.f32 %v1040_v11, 0.0 }
 0x18d   : > { %v702_v10 = vpop.f32.mrf.mxu0 }
 0x18e   : > { %v703_v17 = vadd.f32 %v2064_v14, %v702_v10 }
 0x190   : > { %1827 = vmatmul.msk.bf16.gmra.mxu0 %vm512_vm1, %v1941_v9  ;;  %v814_v22 = vmax.f32 %v703_v17, 0.0 }
 0x191   : > { %v1041_v13 = vpop.f32.mrf.mxu1 }
 0x192   : > { %v1042_v15 = vadd.f32 %v2124_v25, %v1041_v13 }
 0x194   : > { %v1179_v18 = vmax.f32 %v1042_v15, 0.0 }
 0x195   : > { %v704_v19 = vpop.f32.mrf.mxu0 }
 0x196   : > { %v705_v20 = vadd.f32 %v2064_v14, %v704_v19  ;;  %v1235_v21 = vpack.c.bf16 %v1179_v18, %v1178_v16 }
 0x198   : > { %v815_v23 = vmax.f32 %v705_v20, 0.0  ;;  %1890 = vmatmul.msk.bf16.gmra.mxu2 %vm898_vm2, %v1235_v21 }
 0x199   : > { %v1044_v24 = vpop.f32.mrf.mxu1 }
 0x19a   : > { %v862_v26 = vpack.c.bf16 %v815_v23, %v814_v22  ;;  %v1045_v28 = vadd.f32 %v2124_v25, %v1044_v24  ;;  %v1948_v22 = vld [vmem:[%s2036_s9 + $0xf8] sm:$0xff] }
 0x19b   : > { %1834 = vmatmul.msk.bf16.gmra.mxu3 %vm512_vm1, %v1948_v22 }
 0x19c   : > { %1859 = vmatmul.msk.bf16.gmra.mxu1 %vm898_vm2, %v862_v26  ;;  %v1180_v32 = vmax.f32 %v1045_v28, 0.0 }
 0x19d   : > { %v707_v27 = vpop.f32.mrf.mxu0 }
 0x19e   : > { %v708_v33 = vadd.f32 %v2064_v14, %v707_v27 }
 0x1a0   : > { %v816_v38 = vmax.f32 %v708_v33, 0.0 }
 0x1a1   : > { %v1046_v30 = vpop.f32.mrf.mxu1 }
 0x1a2   : > { %v1047_v31 = vadd.f32 %v2124_v25, %v1046_v30 }
 0x1a4   : > { %v1181_v34 = vmax.f32 %v1047_v31, 0.0 }
 0x1a5   : > { %v709_v35 = vpop.f32.mrf.mxu0 }
 0x1a6   : > { %v710_v36 = vadd.f32 %v2064_v14, %v709_v35  ;;  %v1236_v37 = vpack.c.bf16 %v1181_v34, %v1180_v32 }
 0x1a8   : > { %v817_v39 = vmax.f32 %v710_v36, 0.0  ;;  %1891 = vmatmul.msk.bf16.gmra.mxu2 %vm898_vm2, %v1236_v37 }
 0x1a9   : > { %v1049_v41 = vpop.f32.mrf.mxu1 }
 0x1aa   : > { %v863_v42 = vpack.c.bf16 %v817_v39, %v816_v38  ;;  %v1050_v46 = vadd.f32 %v2124_v25, %v1049_v41 }
 0x1ab   : > { %v1385_v43 = vpop.f32.mrf.mxu2 }
 0x1ac   : > { %v1386_v44 = vadd.f32 %v2210_v40, %v1385_v43  ;;  %1860 = vmatmul.msk.bf16.gmra.mxu1 %vm898_vm2, %v863_v42  ;;  %v1182_v51 = vmax.f32 %v1050_v46, 0.0 }
 0x1ad   : > { %v712_v45 = vpop.f32.mrf.mxu0 }
 0x1ae   : > { %1546 = vst.msk [vmem:[%s2215_s29] sm:$0xff] %vm1545_vm3, %v1386_v44  ;;  %v713_v52 = vadd.f32 %v2064_v14, %v712_v45 }
 0x1b0   : > { %v818_v57 = vmax.f32 %v713_v52, 0.0 }
 0x1b1   : > { %v1051_v48 = vpop.f32.mrf.mxu1 }
 0x1b2   : > { %v1052_v49 = vadd.f32 %v2124_v25, %v1051_v48 }
 0x1b3   : > { %v1387_v50 = vpop.f32.mrf.mxu2 }
 0x1b4   : > { %v1183_v53 = vmax.f32 %v1052_v49, 0.0  ;;  %v1388_v54 = vadd.f32 %v2210_v40, %v1387_v50 }
 0x1b5   : > { %v714_v55 = vpop.f32.mrf.mxu0 }
 0x1b6   : > { %1547 = vst.msk [vmem:[%s2215_s29 + $0x8] sm:$0xff] %vm1545_vm3, %v1388_v54  ;;  %v715_v56 = vadd.f32 %v2064_v14, %v714_v55  ;;  %v1237_v7 = vpack.c.bf16 %v1183_v53, %v1182_v51 }
 0x1b8   : > { %v819_v58 = vmax.f32 %v715_v56, 0.0  ;;  %1892 = vmatmul.msk.bf16.gmra.mxu2 %vm898_vm2, %v1237_v7 }
 0x1b9   : > { %v1054_v59 = vpop.f32.mrf.mxu1 }
 0x1ba   : > { %v864_v60 = vpack.c.bf16 %v819_v58, %v818_v57  ;;  %v1055_v63 = vadd.f32 %v2124_v25, %v1054_v59 }
 0x1bb   : > { %v1390_v61 = vpop.f32.mrf.mxu2 }
 0x1bc   : > { %v1391_v8 = vadd.f32 %v2210_v40, %v1390_v61  ;;  %1861 = vmatmul.msk.bf16.gmra.mxu1 %vm898_vm2, %v864_v60  ;;  %v1184_v4 = vmax.f32 %v1055_v63, 0.0 }
 0x1bd   : > { %v717_v62 = vpop.f32.mrf.mxu0 }
 0x1be   : > { %1548 = vst.msk [vmem:[%s2215_s29 + $0x10] sm:$0xff] %vm1545_vm3, %v1391_v8  ;;  %v718_v5 = vadd.f32 %v2064_v14, %v717_v62 }
 0x1c0   : > { %v820_v13 = vmax.f32 %v718_v5, 0.0 }
 0x1c1   : > { %v1056_v1 = vpop.f32.mrf.mxu1 }
 0x1c2   : > { %v1057_v2 = vadd.f32 %v2124_v25, %v1056_v1 }
 0x1c3   : > { %v1392_v3 = vpop.f32.mrf.mxu2 }
 0x1c4   : > { %v1185_v6 = vmax.f32 %v1057_v2, 0.0  ;;  %v1393_v9 = vadd.f32 %v2210_v40, %v1392_v3 }
 0x1c5   : > { %v719_v10 = vpop.f32.mrf.mxu0 }
 0x1c6   : > { %1549 = vst.msk [vmem:[%s2215_s29 + $0x18] sm:$0xff] %vm1545_vm3, %v1393_v9  ;;  %v720_v11 = vadd.f32 %v2064_v14, %v719_v10  ;;  %v1238_v12 = vpack.c.bf16 %v1185_v6, %v1184_v4 }
 0x1c8   : > { %v821_v15 = vmax.f32 %v720_v11, 0.0  ;;  %1893 = vmatmul.msk.bf16.gmra.mxu2 %vm898_vm2, %v1238_v12 }
 0x1c9   : > { %v1059_v16 = vpop.f32.mrf.mxu1 }
 0x1ca   : > { %v865_v17 = vpack.c.bf16 %v821_v15, %v820_v13  ;;  %v1060_v21 = vadd.f32 %v2124_v25, %v1059_v16  ;;  %v747_v15 = vpop.f32.mrf.mxu3 }
 0x1cb   : > { %v1395_v18 = vpop.f32.mrf.mxu2 }
 0x1cc   : > { %v1396_v19 = vadd.f32 %v2210_v40, %v1395_v18  ;;  %1862 = vmatmul.msk.bf16.gmra.mxu1 %vm898_vm2, %v865_v17  ;;  %v1186_v27 = vmax.f32 %v1060_v21, 0.0 }
 0x1cd   : > { %v722_v20 = vpop.f32.mrf.mxu0 }
 0x1ce   : > { %1550 = vst.msk [vmem:[%s2215_s29 + $0x20] sm:$0xff] %vm1545_vm3, %v1396_v19  ;;  %v723_v28 = vadd.f32 %v2064_v14, %v722_v20 }
 0x1d0   : > { %v822_v34 = vmax.f32 %v723_v28, 0.0 }
 0x1d1   : > { %v1061_v23 = vpop.f32.mrf.mxu1 }
 0x1d2   : > { %v1062_v24 = vadd.f32 %v2124_v25, %v1061_v23  ;;  %v749_v28 = vpop.f32.mrf.mxu3 }
 0x1d3   : > { %v1397_v26 = vpop.f32.mrf.mxu2 }
 0x1d4   : > { %v1187_v29 = vmax.f32 %v1062_v24, 0.0  ;;  %v1398_v30 = vadd.f32 %v2210_v40, %v1397_v26 }
 0x1d5   : > { %v724_v31 = vpop.f32.mrf.mxu0 }
 0x1d6   : > { %1551 = vst.msk [vmem:[%s2215_s29 + $0x28] sm:$0xff] %vm1545_vm3, %v1398_v30  ;;  %v725_v32 = vadd.f32 %v2064_v14, %v724_v31  ;;  %v1239_v33 = vpack.c.bf16 %v1187_v29, %v1186_v27 }
 0x1d8   : > { %v823_v35 = vmax.f32 %v725_v32, 0.0  ;;  %1894 = vmatmul.msk.bf16.gmra.mxu2 %vm898_vm2, %v1239_v33 }
 0x1d9   : > { %v1064_v36 = vpop.f32.mrf.mxu1 }
 0x1da   : > { %v866_v37 = vpack.c.bf16 %v823_v35, %v822_v34  ;;  %v1065_v42 = vadd.f32 %v2124_v25, %v1064_v36 }
 0x1db   : > { %v1400_v38 = vpop.f32.mrf.mxu2 }
 0x1dc   : > { %v1401_v39 = vadd.f32 %v2210_v40, %v1400_v38  ;;  %1863 = vmatmul.msk.bf16.gmra.mxu1 %vm898_vm2, %v866_v37  ;;  %v1188_v46 = vmax.f32 %v1065_v42, 0.0  ;;  %v752_v38 = vpop.f32.mrf.mxu3 }
 0x1dd   : > { %v727_v41 = vpop.f32.mrf.mxu0 }
 0x1de   : > { %1552 = vst.msk [vmem:[%s2215_s29 + $0x30] sm:$0xff] %vm1545_vm3, %v1401_v39  ;;  %v728_v47 = vadd.f32 %v2064_v14, %v727_v41 }
 0x1e0   : > { %v824_v53 = vmax.f32 %v728_v47, 0.0 }
 0x1e1   : > { %v1066_v43 = vpop.f32.mrf.mxu1 }
 0x1e2   : > { %v1067_v44 = vadd.f32 %v2124_v25, %v1066_v43 }
 0x1e3   : > { %v1402_v45 = vpop.f32.mrf.mxu2 }
 0x1e4   : > { %v1189_v48 = vmax.f32 %v1067_v44, 0.0  ;;  %v1403_v49 = vadd.f32 %v2210_v40, %v1402_v45 }
 0x1e5   : > { %v729_v50 = vpop.f32.mrf.mxu0 }
 0x1e6   : > { %v1240_v51 = vpack.c.bf16 %v1189_v48, %v1188_v46  ;;  %1553 = vst.msk [vmem:[%s2215_s29 + $0x38] sm:$0xff] %vm1545_vm3, %v1403_v49  ;;  %v730_v52 = vadd.f32 %v2064_v14, %v729_v50 }
 0x1e8   : > { %v825_v54 = vmax.f32 %v730_v52, 0.0  ;;  %1895 = vmatmul.msk.bf16.gmra.mxu2 %vm898_vm2, %v1240_v51 }
 0x1e9   : > { %v1069_v55 = vpop.f32.mrf.mxu1 }
 0x1ea   : > { %v867_v56 = vpack.c.bf16 %v825_v54, %v824_v53  ;;  %v1070_v59 = vadd.f32 %v2124_v25, %v1069_v55  ;;  %v754_v54 = vpop.f32.mrf.mxu3 }
 0x1eb   : > { %v1405_v7 = vpop.f32.mrf.mxu2 }
 0x1ec   : > { %v1406_v57 = vadd.f32 %v2210_v40, %v1405_v7  ;;  %1864 = vmatmul.msk.bf16.gmra.mxu1 %vm898_vm2, %v867_v56  ;;  %v1190_v62 = vmax.f32 %v1070_v59, 0.0 }
 0x1ed   : > { %v732_v58 = vpop.f32.mrf.mxu0 }
 0x1ee   : > { %1554 = vst.msk [vmem:[%s2215_s29 + $0x40] sm:$0xff] %vm1545_vm3, %v1406_v57  ;;  %v733_v63 = vadd.f32 %v2064_v14, %v732_v58  ;;  %v748_v57 = vadd.f32 %v2064_v14, %v747_v15  ;;  %v750_v58 = vadd.f32 %v2064_v14, %v749_v28 }
 0x1f0   : > { %v826_v5 = vmax.f32 %v733_v63, 0.0 }
 0x1f1   : > { %v1071_v60 = vpop.f32.mrf.mxu1 }
 0x1f2   : > { %v1072_v61 = vadd.f32 %v2124_v25, %v1071_v60  ;;  %v757_v63 = vpop.f32.mrf.mxu3 }
 0x1f3   : > { %v1407_v8 = vpop.f32.mrf.mxu2 }
 0x1f4   : > { %v1191_v0 = vmax.f32 %v1072_v61, 0.0  ;;  %v1408_v1 = vadd.f32 %v2210_v40, %v1407_v8 }
 0x1f5   : > { %v734_v2 = vpop.f32.mrf.mxu0 }
 0x1f6   : > { %v1241_v3 = vpack.c.bf16 %v1191_v0, %v1190_v62  ;;  %1555 = vst.msk [vmem:[%s2215_s29 + $0x48] sm:$0xff] %vm1545_vm3, %v1408_v1  ;;  %v735_v4 = vadd.f32 %v2064_v14, %v734_v2  ;;  %v832_v0 = vmax.f32 %v748_v57, 0.0  ;;  %v833_v1 = vmax.f32 %v750_v58, 0.0 }
 0x1f8   : > { %v827_v6 = vmax.f32 %v735_v4, 0.0  ;;  %1896 = vmatmul.msk.bf16.gmra.mxu2 %vm898_vm2, %v1241_v3  ;;  %v871_v4 = vpack.c.bf16 %v833_v1, %v832_v0  ;;  %v1969_v1 = vld [vmem:[%s2534_s2] ss:$0 sm:$0xff] }
 0x1f9   : > { %v1074_v9 = vpop.f32.mrf.mxu1 }
 0x1fa   : > { %v868_v10 = vpack.c.bf16 %v827_v6, %v826_v5  ;;  %v1075_v16 = vadd.f32 %v2124_v25, %v1074_v9  ;;  %v759_v9 = vpop.f32.mrf.mxu3 }
 0x1fb   : > { %v1410_v11 = vpop.f32.mrf.mxu2 }
 0x1fc   : > { %v1411_v12 = vadd.f32 %v2210_v40, %v1410_v11  ;;  %1865 = vmatmul.msk.bf16.gmra.mxu1 %vm898_vm2, %v868_v10  ;;  %v1192_v20 = vmax.f32 %v1075_v16, 0.0 }
 0x1fd   : > { %v737_v13 = vpop.f32.mrf.mxu0 }
 0x1fe   : > { %1556 = vst.msk [vmem:[%s2215_s29 + $0x50] sm:$0xff] %vm1545_vm3, %v1411_v12  ;;  %v738_v21 = vadd.f32 %v2064_v14, %v737_v13  ;;  %v753_v12 = vadd.f32 %v2064_v14, %v752_v38  ;;  %v755_v13 = vadd.f32 %v2064_v14, %v754_v54 }
 0x200   : > { %v828_v29 = vmax.f32 %v738_v21, 0.0  ;;  %v835_v21 = vmax.f32 %v755_v13, 0.0 }
 0x201   : > { %v1076_v17 = vpop.f32.mrf.mxu1 }
 0x202   : > { %v1077_v18 = vadd.f32 %v2124_v25, %v1076_v17 }
 0x203   : > { %v1412_v19 = vpop.f32.mrf.mxu2 }
 0x204   : > { %v1193_v22 = vmax.f32 %v1077_v18, 0.0  ;;  %v1413_v23 = vadd.f32 %v2210_v40, %v1412_v19 }
 0x205   : > { %v739_v24 = vpop.f32.mrf.mxu0 }
 0x206   : > { %v1242_v26 = vpack.c.bf16 %v1193_v22, %v1192_v20  ;;  %1557 = vst.msk [vmem:[%s2215_s29 + $0x58] sm:$0xff] %vm1545_vm3, %v1413_v23  ;;  %v740_v27 = vadd.f32 %v2064_v14, %v739_v24  ;;  %v834_v20 = vmax.f32 %v753_v12, 0.0  ;;  %v762_v24 = vpop.f32.mrf.mxu3 }
 0x208   : > { %v829_v30 = vmax.f32 %v740_v27, 0.0  ;;  %1897 = vmatmul.msk.bf16.gmra.mxu2 %vm898_vm2, %v1242_v26  ;;  %v872_v26 = vpack.c.bf16 %v835_v21, %v834_v20 }
 0x209   : > { %v1079_v31 = vpop.f32.mrf.mxu1 }
 0x20a   : > { %v869_v32 = vpack.c.bf16 %v829_v30, %v828_v29  ;;  %v1080_v36 = vadd.f32 %v2124_v25, %v1079_v31  ;;  %v758_v31 = vadd.f32 %v2064_v14, %v757_v63 }
 0x20b   : > { %v1415_v33 = vpop.f32.mrf.mxu2 }
 0x20c   : > { %v1416_v34 = vadd.f32 %v2210_v40, %v1415_v33  ;;  %1866 = vmatmul.msk.bf16.gmra.mxu1 %vm898_vm2, %v869_v32  ;;  %v1194_v42 = vmax.f32 %v1080_v36, 0.0  ;;  %v760_v32 = vadd.f32 %v2064_v14, %v759_v9 }
 0x20d   : > { %v742_v35 = vpop.f32.mrf.mxu0 }
 0x20e   : > { %1558 = vst.msk [vmem:[%s2215_s29 + $0x60] sm:$0xff] %vm1545_vm3, %v1416_v34  ;;  %v743_v43 = vadd.f32 %v2064_v14, %v742_v35  ;;  %v764_v35 = vpop.f32.mrf.mxu3 }
 0x210   : > { %v830_v49 = vmax.f32 %v743_v43, 0.0 }
 0x211   : > { %v1081_v37 = vpop.f32.mrf.mxu1 }
 0x212   : > { %v1082_v39 = vadd.f32 %v2124_v25, %v1081_v37 }
 0x213   : > { %v1417_v41 = vpop.f32.mrf.mxu2 }
 0x214   : > { %v1195_v44 = vmax.f32 %v1082_v39, 0.0  ;;  %v1418_v45 = vadd.f32 %v2210_v40, %v1417_v41  ;;  %v836_v39 = vmax.f32 %v758_v31, 0.0  ;;  %v837_v41 = vmax.f32 %v760_v32, 0.0 }
 0x215   : > { %v744_v46 = vpop.f32.mrf.mxu0 }
 0x216   : > { %v1243_v47 = vpack.c.bf16 %v1195_v44, %v1194_v42  ;;  %1559 = vst.msk [vmem:[%s2215_s29 + $0x68] sm:$0xff] %vm1545_vm3, %v1418_v45  ;;  %v745_v48 = vadd.f32 %v2064_v14, %v744_v46  ;;  %v873_v44 = vpack.c.bf16 %v837_v41, %v836_v39 }
 0x218   : > { %v831_v50 = vmax.f32 %v745_v48, 0.0  ;;  %1898 = vmatmul.msk.bf16.gmra.mxu2 %vm898_vm2, %v1243_v47  ;;  %v767_v47 = vpop.f32.mrf.mxu3 }
 0x219   : > { %v1084_v51 = vpop.f32.mrf.mxu1 }
 0x21a   : > { %v870_v52 = vpack.c.bf16 %v831_v50, %v830_v49  ;;  %v1085_v56 = vadd.f32 %v2124_v25, %v1084_v51  ;;  %v763_v50 = vadd.f32 %v2064_v14, %v762_v24  ;;  %v765_v51 = vadd.f32 %v2064_v14, %v764_v35 }
 0x21b   : > { %v1420_v53 = vpop.f32.mrf.mxu2 }
 0x21c   : > { %v1421_v55 = vadd.f32 %v2210_v40, %v1420_v53  ;;  %1867 = vmatmul.msk.bf16.vlgmr.msrb.gmra.mxu3 %vm898_vm2, %v870_v52  ;;  %v1196_v61 = vmax.f32 %v1085_v56, 0.0  ;;  %v839_v57 = vmax.f32 %v765_v51, 0.0 }
 0x21e   : > { %1560 = vst.msk [vmem:[%s2215_s29 + $0x70] sm:$0xff] %vm1545_vm3, %v1421_v55 }
 0x221   : > { %v1086_v7 = vpop.f32.mrf.mxu1 }
 0x222   : > { %v1087_v59 = vadd.f32 %v2124_v25, %v1086_v7  ;;  %v838_v7 = vmax.f32 %v763_v50, 0.0 }
 0x223   : > { %v1422_v60 = vpop.f32.mrf.mxu2 }
 0x224   : > { %v1197_v8 = vmax.f32 %v1087_v59, 0.0  ;;  %v1423_v62 = vadd.f32 %v2210_v40, %v1422_v60  ;;  %v769_v59 = vpop.f32.mrf.mxu3 }
 0x226   : > { %v1244_v2 = vpack.c.bf16 %v1197_v8, %v1196_v61  ;;  %1561 = vst.msk [vmem:[%s2215_s29 + $0x78] sm:$0xff] %vm1545_vm3, %v1423_v62  ;;  %v874_v61 = vpack.c.bf16 %v839_v57, %v838_v7 }
 0x228   : > { %1899 = vmatmul.msk.bf16.gmra.mxu2 %vm898_vm2, %v1244_v2  ;;  %v768_v2 = vadd.f32 %v1969_v1, %v767_v47 }
 0x229   : > { %v1089_v3 = vpop.f32.mrf.mxu1 }
 0x22a   : > { %v1090_v10 = vadd.f32 %v2124_v25, %v1089_v3  ;;  %v770_v3 = vadd.f32 %v1969_v1, %v769_v59 }
 0x22b   : > { %v1425_v5 = vpop.f32.mrf.mxu2 }
 0x22c   : > { %v1426_v6 = vadd.f32 %v2210_v40, %v1425_v5  ;;  %1868 = vmatmul.msk.bf16.gmra.mxu3 %vm898_vm2, %v871_v4  ;;  %v1198_v17 = vmax.f32 %v1090_v10, 0.0  ;;  %v772_v0 = vpop.f32.mrf.mxu3  ;;  %v841_v12 = vmax.f32 %v770_v3, 0.0 }
 0x22e   : > { %1562 = vst.msk [vmem:[%s2215_s29 + $0x80] sm:$0xff] %vm1545_vm3, %v1426_v6 }
 0x231   : > { %v1091_v11 = vpop.f32.mrf.mxu1 }
 0x232   : > { %v1092_v15 = vadd.f32 %v2124_v25, %v1091_v11  ;;  %v840_v11 = vmax.f32 %v768_v2, 0.0 }
 0x233   : > { %v1427_v16 = vpop.f32.mrf.mxu2 }
 0x234   : > { %v1199_v18 = vmax.f32 %v1092_v15, 0.0  ;;  %v1428_v19 = vadd.f32 %v2210_v40, %v1427_v16  ;;  %v875_v16 = vpack.c.bf16 %v841_v12, %v840_v11 }
 0x236   : > { %v1245_v22 = vpack.c.bf16 %v1199_v18, %v1198_v17  ;;  %1563 = vst.msk [vmem:[%s2215_s29 + $0x88] sm:$0xff] %vm1545_vm3, %v1428_v19  ;;  %v774_v18 = vpop.f32.mrf.mxu3 }
 0x238   : > { %1900 = vmatmul.msk.bf16.gmra.mxu2 %vm898_vm2, %v1245_v22  ;;  %v773_v22 = vadd.f32 %v1969_v1, %v772_v0 }
 0x239   : > { %v1094_v23 = vpop.f32.mrf.mxu1 }
 0x23a   : > { %v1095_v29 = vadd.f32 %v2124_v25, %v1094_v23  ;;  %v775_v23 = vadd.f32 %v1969_v1, %v774_v18  ;;  %v842_v31 = vmax.f32 %v773_v22, 0.0 }
 0x23b   : > { %v1430_v27 = vpop.f32.mrf.mxu2 }
 0x23c   : > { %v1431_v28 = vadd.f32 %v2210_v40, %v1430_v27  ;;  %1869 = vmatmul.msk.bf16.gmra.mxu3 %vm898_vm2, %v872_v26  ;;  %v1200_v36 = vmax.f32 %v1095_v29, 0.0  ;;  %v843_v32 = vmax.f32 %v775_v23, 0.0 }
 0x23e   : > { %1564 = vst.msk [vmem:[%s2215_s29 + $0x90] sm:$0xff] %vm1545_vm3, %v1431_v28  ;;  %v876_v35 = vpack.c.bf16 %v843_v32, %v842_v31 }
 0x241   : > { %v1096_v30 = vpop.f32.mrf.mxu1 }
 0x242   : > { %v1097_v33 = vadd.f32 %v2124_v25, %v1096_v30  ;;  %v777_v30 = vpop.f32.mrf.mxu3 }
 0x243   : > { %v1432_v34 = vpop.f32.mrf.mxu2 }
 0x244   : > { %v1201_v37 = vmax.f32 %v1097_v33, 0.0  ;;  %v1433_v38 = vadd.f32 %v2210_v40, %v1432_v34 }
 0x246   : > { %v1246_v42 = vpack.c.bf16 %v1201_v37, %v1200_v36  ;;  %1565 = vst.msk [vmem:[%s2215_s29 + $0x98] sm:$0xff] %vm1545_vm3, %v1433_v38 }
 0x248   : > { %1901 = vmatmul.msk.bf16.gmra.mxu2 %vm898_vm2, %v1246_v42  ;;  %v778_v42 = vadd.f32 %v1969_v1, %v777_v30 }
 0x249   : > { %v1099_v43 = vpop.f32.mrf.mxu1 }
 0x24a   : > { %v1100_v48 = vadd.f32 %v2124_v25, %v1099_v43  ;;  %v779_v38 = vpop.f32.mrf.mxu3 }
 0x24b   : > { %v1435_v45 = vpop.f32.mrf.mxu2  ;;  %v780_v43 = vadd.f32 %v1969_v1, %v779_v38 }
 0x24c   : > { %v1436_v46 = vadd.f32 %v2210_v40, %v1435_v45  ;;  %1870 = vmatmul.msk.bf16.gmra.mxu3 %vm898_vm2, %v873_v44  ;;  %v1202_v54 = vmax.f32 %v1100_v48, 0.0 }
 0x24d   : > { %v845_v50 = vmax.f32 %v780_v43, 0.0 }
 0x24e   : > { %1566 = vst.msk [vmem:[%s2215_s29 + $0xa0] sm:$0xff] %vm1545_vm3, %v1436_v46 }
 0x251   : > { %v1101_v49 = vpop.f32.mrf.mxu1 }
 0x252   : > { %v1102_v52 = vadd.f32 %v2124_v25, %v1101_v49  ;;  %v844_v49 = vmax.f32 %v778_v42, 0.0 }
 0x253   : > { %v1437_v53 = vpop.f32.mrf.mxu2 }
 0x254   : > { %v1203_v55 = vmax.f32 %v1102_v52, 0.0  ;;  %v1438_v56 = vadd.f32 %v2210_v40, %v1437_v53  ;;  %v877_v53 = vpack.c.bf16 %v845_v50, %v844_v49 }
 0x256   : > { %v1247_v58 = vpack.c.bf16 %v1203_v55, %v1202_v54  ;;  %1567 = vst.msk [vmem:[%s2215_s29 + $0xa8] sm:$0xff] %vm1545_vm3, %v1438_v56 }
 0x258   : > { %1902 = vmatmul.msk.bf16.gmra.mxu2 %vm898_vm2, %v1247_v58 }
 0x259   : > { %v1104_v60 = vpop.f32.mrf.mxu1 }
 0x25a   : > { %v1105_v62 = vadd.f32 %v2124_v25, %v1104_v60 }
 0x25b   : > { %v1440_v8 = vpop.f32.mrf.mxu2 }
 0x25c   : > { %v1441_v14 = vadd.f32 %v2210_v40, %v1440_v8  ;;  %1871 = vmatmul.msk.bf16.gmra.mxu3 %vm898_vm2, %v874_v61  ;;  %v1204_v6 = vmax.f32 %v1105_v62, 0.0 }
 0x25e   : > { %1568 = vst.msk [vmem:[%s2215_s29 + $0xb0] sm:$0xff] %vm1545_vm3, %v1441_v14 }
 0x261   : > { %v1106_v63 = vpop.f32.mrf.mxu1 }
 0x262   : > { %v1107_v4 = vadd.f32 %v2124_v25, %v1106_v63 }
 0x263   : > { %v1442_v5 = vpop.f32.mrf.mxu2 }
 0x264   : > { %v1205_v9 = vmax.f32 %v1107_v4, 0.0  ;;  %v1443_v10 = vadd.f32 %v2210_v40, %v1442_v5  ;;  %v2408_v4 = vld [vmem:[%s2536_s4] ss:$0 sm:$0xff] }
 0x266   : > { %v1248_v13 = vpack.c.bf16 %v1205_v9, %v1204_v6  ;;  %1569 = vst.msk [vmem:[%s2215_s29 + $0xb8] sm:$0xff] %vm1545_vm3, %v1443_v10 }
 0x268   : > { %1903 = vmatmul.msk.bf16.gmra.mxu2 %vm898_vm2, %v1248_v13 }
 0x269   : > { %v1109_v15 = vpop.f32.mrf.mxu1 }
 0x26a   : > { %v1110_v20 = vadd.f32 %v2124_v25, %v1109_v15 }
 0x26b   : > { %v1445_v17 = vpop.f32.mrf.mxu2 }
 0x26c   : > { %v1446_v19 = vadd.f32 %v2210_v40, %v1445_v17  ;;  %1872 = vmatmul.msk.bf16.gmra.mxu3 %vm898_vm2, %v875_v16  ;;  %v1206_v27 = vmax.f32 %v1110_v20, 0.0 }
 0x26e   : > { %1570 = vst.msk [vmem:[%s2215_s29 + $0xc0] sm:$0xff] %vm1545_vm3, %v1446_v19 }
 0x271   : > { %v1111_v21 = vpop.f32.mrf.mxu1 }
 0x272   : > { %v1112_v24 = vadd.f32 %v2124_v25, %v1111_v21 }
 0x273   : > { %v1447_v26 = vpop.f32.mrf.mxu2 }
 0x274   : > { %v1207_v28 = vmax.f32 %v1112_v24, 0.0  ;;  %v1448_v29 = vadd.f32 %v2210_v40, %v1447_v26 }
 0x276   : > { %v1249_v33 = vpack.c.bf16 %v1207_v28, %v1206_v27  ;;  %1571 = vst.msk [vmem:[%s2215_s29 + $0xc8] sm:$0xff] %vm1545_vm3, %v1448_v29 }
 0x278   : > { %1904 = vmatmul.msk.bf16.gmra.mxu2 %vm898_vm2, %v1249_v33 }
 0x279   : > { %v1114_v34 = vpop.f32.mrf.mxu1 }
 0x27a   : > { %v1115_v39 = vadd.f32 %v2124_v25, %v1114_v34 }
 0x27b   : > { %v1450_v36 = vpop.f32.mrf.mxu2 }
 0x27c   : > { %v1451_v37 = vadd.f32 %v2210_v40, %v1450_v36  ;;  %1873 = vmatmul.msk.bf16.gmra.mxu3 %vm898_vm2, %v876_v35  ;;  %v1208_v46 = vmax.f32 %v1115_v39, 0.0 }
 0x27e   : > { %1572 = vst.msk [vmem:[%s2215_s29 + $0xd0] sm:$0xff] %vm1545_vm3, %v1451_v37 }
 0x281   : > { %v1116_v41 = vpop.f32.mrf.mxu1 }
 0x282   : > { %v1117_v44 = vadd.f32 %v2124_v25, %v1116_v41 }
 0x283   : > { %v1452_v45 = vpop.f32.mrf.mxu2 }
 0x284   : > { %v1209_v47 = vmax.f32 %v1117_v44, 0.0  ;;  %v1453_v48 = vadd.f32 %v2210_v40, %v1452_v45 }
 0x286   : > { %v1250_v51 = vpack.c.bf16 %v1209_v47, %v1208_v46  ;;  %1573 = vst.msk [vmem:[%s2215_s29 + $0xd8] sm:$0xff] %vm1545_vm3, %v1453_v48 }
 0x288   : > { %1905 = vmatmul.msk.bf16.gmra.mxu2 %vm898_vm2, %v1250_v51 }
 0x289   : > { %v1119_v52 = vpop.f32.mrf.mxu1 }
 0x28a   : > { %v1120_v56 = vadd.f32 %v2124_v25, %v1119_v52 }
 0x28b   : > { %v1455_v54 = vpop.f32.mrf.mxu2 }
 0x28c   : > { %v1456_v55 = vadd.f32 %v2210_v40, %v1455_v54  ;;  %1874 = vmatmul.msk.bf16.gmra.mxu3 %vm898_vm2, %v877_v53  ;;  %v1210_v59 = vmax.f32 %v1120_v56, 0.0 }
 0x28e   : > { %1574 = vst.msk [vmem:[%s2215_s29 + $0xe0] sm:$0xff] %vm1545_vm3, %v1456_v55 }
 0x291   : > { %v1121_v7 = vpop.f32.mrf.mxu1 }
 0x292   : > { %v1122_v57 = vadd.f32 %v2124_v25, %v1121_v7 }
 0x293   : > { %v1457_v58 = vpop.f32.mrf.mxu2 }
 0x294   : > { %v1211_v60 = vmax.f32 %v1122_v57, 0.0  ;;  %v1458_v61 = vadd.f32 %v2210_v40, %v1457_v58 }
 0x296   : > { %v1251_v8 = vpack.c.bf16 %v1211_v60, %v1210_v59  ;;  %1575 = vst.msk [vmem:[%s2215_s29 + $0xe8] sm:$0xff] %vm1545_vm3, %v1458_v61 }
 0x298   : > { %1906 = vmatmul.msk.bf16.gmra.mxu2 %vm898_vm2, %v1251_v8 }
 0x29b   : > { %v1460_v14 = vpop.f32.mrf.mxu2 }
 0x29c   : > { %v1461_v62 = vadd.f32 %v2210_v40, %v1460_v14 }
 0x29e   : > { %1576 = vst.msk [vmem:[%s2215_s29 + $0xf0] sm:$0xff] %vm1545_vm3, %v1461_v62 }
 0x29f   : > { %v1124_v63 = vpop.f32.mrf.mxu3 }
 0x2a0   : > { %v1125_v2 = vadd.f32 %v2124_v25, %v1124_v63 }
 0x2a2   : > { %v1212_v6 = vmax.f32 %v1125_v2, 0.0 }
 0x2a3   : > { %v1462_v0 = vpop.f32.mrf.mxu2 }
 0x2a4   : > { %v1463_v1 = vadd.f32 %v2210_v40, %v1462_v0 }
 0x2a6   : > { %1577 = vst.msk [vmem:[%s2215_s29 + $0xf8] sm:$0xff] %vm1545_vm3, %v1463_v1 }
 0x2a7   : > { %v1126_v3 = vpop.f32.mrf.mxu3 }
 0x2a8   : > { %v1127_v5 = vadd.f32 %v2408_v4, %v1126_v3 }
 0x2aa   : > { %v1213_v9 = vmax.f32 %v1127_v5, 0.0 }
 0x2ab   : > { %v1465_v10 = vpop.f32.mrf.mxu2 }
 0x2ac   : > { %v1252_v11 = vpack.c.bf16 %v1213_v9, %v1212_v6  ;;  %v1466_v12 = vadd.f32 %v2210_v40, %v1465_v10 }
 0x2ae   : > { %1578 = vst.msk [vmem:[%s2215_s29 + $0x100] sm:$0xff] %vm1545_vm3, %v1466_v12  ;;  %1907 = vmatmul.msk.bf16.vlgmr.msra.gmra.mxu3 %vm898_vm2, %v1252_v11 }
 0x2af   : > { %v1129_v25 = vpop.f32.mrf.mxu3 }
 0x2b0   : > { %v1130_v16 = vadd.f32 %v2408_v4, %v1129_v25 }
 0x2b2   : > { %v1214_v19 = vmax.f32 %v1130_v16, 0.0 }
 0x2b3   : > { %v1467_v13 = vpop.f32.mrf.mxu2 }
 0x2b4   : > { %v1468_v15 = vadd.f32 %v2210_v40, %v1467_v13 }
 0x2b6   : > { %1579 = vst.msk [vmem:[%s2215_s29 + $0x108] sm:$0xff] %vm1545_vm3, %v1468_v15 }
 0x2b7   : > { %v1131_v17 = vpop.f32.mrf.mxu3 }
 0x2b8   : > { %v1132_v18 = vadd.f32 %v2408_v4, %v1131_v17 }
 0x2ba   : > { %v1215_v20 = vmax.f32 %v1132_v18, 0.0 }
 0x2bb   : > { %v1470_v21 = vpop.f32.mrf.mxu2 }
 0x2bc   : > { %v1253_v22 = vpack.c.bf16 %v1215_v20, %v1214_v19  ;;  %v1471_v23 = vadd.f32 %v2210_v40, %v1470_v21 }
 0x2be   : > { %1580 = vst.msk [vmem:[%s2215_s29 + $0x110] sm:$0xff] %vm1545_vm3, %v1471_v23  ;;  %1908 = vmatmul.msk.bf16.gmra.mxu3 %vm898_vm2, %v1253_v22 }
 0x2bf   : > { %v1134_v24 = vpop.f32.mrf.mxu3 }
 0x2c0   : > { %v1135_v28 = vadd.f32 %v2408_v4, %v1134_v24 }
 0x2c2   : > { %v1216_v31 = vmax.f32 %v1135_v28, 0.0 }
 0x2c3   : > { %v1472_v26 = vpop.f32.mrf.mxu2 }
 0x2c4   : > { %v1473_v27 = vadd.f32 %v2210_v40, %v1472_v26 }
 0x2c6   : > { %1581 = vst.msk [vmem:[%s2215_s29 + $0x118] sm:$0xff] %vm1545_vm3, %v1473_v27 }
 0x2c7   : > { %v1136_v29 = vpop.f32.mrf.mxu3 }
 0x2c8   : > { %v1137_v30 = vadd.f32 %v2408_v4, %v1136_v29 }
 0x2ca   : > { %v1217_v32 = vmax.f32 %v1137_v30, 0.0 }
 0x2cb   : > { %v1475_v33 = vpop.f32.mrf.mxu2 }
 0x2cc   : > { %v1254_v34 = vpack.c.bf16 %v1217_v32, %v1216_v31  ;;  %v1476_v35 = vadd.f32 %v2210_v40, %v1475_v33 }
 0x2ce   : > { %1582 = vst.msk [vmem:[%s2215_s29 + $0x120] sm:$0xff] %vm1545_vm3, %v1476_v35  ;;  %1909 = vmatmul.msk.bf16.gmra.mxu3 %vm898_vm2, %v1254_v34 }
 0x2cf   : > { %v1139_v36 = vpop.f32.mrf.mxu3 }
 0x2d0   : > { %v1140_v39 = vadd.f32 %v2408_v4, %v1139_v36 }
 0x2d2   : > { %v1218_v43 = vmax.f32 %v1140_v39, 0.0 }
 0x2d3   : > { %v1477_v37 = vpop.f32.mrf.mxu2 }
 0x2d4   : > { %v1478_v38 = vadd.f32 %v2210_v40, %v1477_v37 }
 0x2d6   : > { %1583 = vst.msk [vmem:[%s2215_s29 + $0x128] sm:$0xff] %vm1545_vm3, %v1478_v38 }
 0x2d7   : > { %v1141_v41 = vpop.f32.mrf.mxu3 }
 0x2d8   : > { %v1142_v42 = vadd.f32 %v2408_v4, %v1141_v41 }
 0x2da   : > { %v1219_v44 = vmax.f32 %v1142_v42, 0.0 }
 0x2db   : > { %v1480_v45 = vpop.f32.mrf.mxu2 }
 0x2dc   : > { %v1255_v46 = vpack.c.bf16 %v1219_v44, %v1218_v43  ;;  %v1481_v47 = vadd.f32 %v2210_v40, %v1480_v45 }
 0x2de   : > { %1584 = vst.msk [vmem:[%s2215_s29 + $0x130] sm:$0xff] %vm1545_vm3, %v1481_v47  ;;  %1910 = vmatmul.msk.bf16.gmra.mxu3 %vm898_vm2, %v1255_v46 }
 0x2df   : > { %v1144_v48 = vpop.f32.mrf.mxu3 }
 0x2e0   : > { %v1145_v51 = vadd.f32 %v2408_v4, %v1144_v48 }
 0x2e2   : > { %v1220_v54 = vmax.f32 %v1145_v51, 0.0 }
 0x2e3   : > { %v1482_v49 = vpop.f32.mrf.mxu2 }
 0x2e4   : > { %v1483_v50 = vadd.f32 %v2210_v40, %v1482_v49 }
 0x2e6   : > { %1585 = vst.msk [vmem:[%s2215_s29 + $0x138] sm:$0xff] %vm1545_vm3, %v1483_v50 }
 0x2e7   : > { %v1146_v52 = vpop.f32.mrf.mxu3 }
 0x2e8   : > { %v1147_v53 = vadd.f32 %v2408_v4, %v1146_v52 }
 0x2ea   : > { %v1221_v55 = vmax.f32 %v1147_v53, 0.0 }
 0x2eb   : > { %v1485_v56 = vpop.f32.mrf.mxu2 }
 0x2ec   : > { %v1256_v7 = vpack.c.bf16 %v1221_v55, %v1220_v54  ;;  %v1486_v57 = vadd.f32 %v2210_v40, %v1485_v56 }
 0x2ee   : > { %1586 = vst.msk [vmem:[%s2215_s29 + $0x140] sm:$0xff] %vm1545_vm3, %v1486_v57  ;;  %1911 = vmatmul.msk.bf16.gmra.mxu3 %vm898_vm2, %v1256_v7 }
 0x2ef   : > { %v1149_v58 = vpop.f32.mrf.mxu3 }
 0x2f0   : > { %v1150_v61 = vadd.f32 %v2408_v4, %v1149_v58 }
 0x2f2   : > { %v1222_v62 = vmax.f32 %v1150_v61, 0.0 }
 0x2f3   : > { %v1487_v59 = vpop.f32.mrf.mxu2 }
 0x2f4   : > { %v1488_v60 = vadd.f32 %v2210_v40, %v1487_v59 }
 0x2f6   : > { %1587 = vst.msk [vmem:[%s2215_s29 + $0x148] sm:$0xff] %vm1545_vm3, %v1488_v60 }
 0x2f7   : > { %v1151_v8 = vpop.f32.mrf.mxu3 }
 0x2f8   : > { %v1152_v14 = vadd.f32 %v2408_v4, %v1151_v8 }
 0x2fa   : > { %v1223_v63 = vmax.f32 %v1152_v14, 0.0 }
 0x2fb   : > { %v1490_v0 = vpop.f32.mrf.mxu2 }
 0x2fc   : > { %v1257_v1 = vpack.c.bf16 %v1223_v63, %v1222_v62  ;;  %v1491_v2 = vadd.f32 %v2210_v40, %v1490_v0 }
 0x2fe   : > { %1588 = vst.msk [vmem:[%s2215_s29 + $0x150] sm:$0xff] %vm1545_vm3, %v1491_v2  ;;  %1912 = vmatmul.msk.bf16.gmra.mxu3 %vm898_vm2, %v1257_v1 }
 0x2ff   : > { %v1154_v3 = vpop.f32.mrf.mxu3 }
 0x300   : > { %v1155_v9 = vadd.f32 %v2408_v4, %v1154_v3 }
 0x302   : > { %v1224_v12 = vmax.f32 %v1155_v9, 0.0 }
 0x303   : > { %v1492_v5 = vpop.f32.mrf.mxu2 }
 0x304   : > { %v1493_v6 = vadd.f32 %v2210_v40, %v1492_v5 }
 0x306   : > { %1589 = vst.msk [vmem:[%s2215_s29 + $0x158] sm:$0xff] %vm1545_vm3, %v1493_v6 }
 0x307   : > { %v1156_v10 = vpop.f32.mrf.mxu3 }
 0x308   : > { %v1157_v11 = vadd.f32 %v2408_v4, %v1156_v10 }
 0x30a   : > { %v1225_v25 = vmax.f32 %v1157_v11, 0.0 }
 0x30b   : > { %v1495_v13 = vpop.f32.mrf.mxu2 }
 0x30c   : > { %v1258_v15 = vpack.c.bf16 %v1225_v25, %v1224_v12  ;;  %v1496_v16 = vadd.f32 %v2210_v40, %v1495_v13 }
 0x30e   : > { %1590 = vst.msk [vmem:[%s2215_s29 + $0x160] sm:$0xff] %vm1545_vm3, %v1496_v16  ;;  %1913 = vmatmul.msk.bf16.gmra.mxu3 %vm898_vm2, %v1258_v15 }
 0x30f   : > { %v1159_v17 = vpop.f32.mrf.mxu3 }
 0x310   : > { %v1160_v20 = vadd.f32 %v2408_v4, %v1159_v17 }
 0x312   : > { %v1226_v23 = vmax.f32 %v1160_v20, 0.0 }
 0x313   : > { %v1497_v18 = vpop.f32.mrf.mxu2 }
 0x314   : > { %v1498_v19 = vadd.f32 %v2210_v40, %v1497_v18 }
 0x316   : > { %1591 = vst.msk [vmem:[%s2215_s29 + $0x168] sm:$0xff] %vm1545_vm3, %v1498_v19 }
 0x317   : > { %v1161_v21 = vpop.f32.mrf.mxu3 }
 0x318   : > { %v1162_v22 = vadd.f32 %v2408_v4, %v1161_v21 }
 0x31a   : > { %v1227_v24 = vmax.f32 %v1162_v22, 0.0 }
 0x31b   : > { %v1500_v26 = vpop.f32.mrf.mxu2 }
 0x31c   : > { %v1259_v27 = vpack.c.bf16 %v1227_v24, %v1226_v23  ;;  %v1501_v28 = vadd.f32 %v2210_v40, %v1500_v26 }
 0x31e   : > { %1592 = vst.msk [vmem:[%s2215_s29 + $0x170] sm:$0xff] %vm1545_vm3, %v1501_v28  ;;  %1914 = vmatmul.msk.bf16.gmra.mxu3 %vm898_vm2, %v1259_v27 }
 0x323   : > { %v1502_v29 = vpop.f32.mrf.mxu2 }
 0x324   : > { %v1503_v30 = vadd.f32 %v2210_v40, %v1502_v29 }
 0x326   : > { %1593 = vst.msk [vmem:[%s2215_s29 + $0x178] sm:$0xff] %vm1545_vm3, %v1503_v30 }
 0x331   : > { %v1505_v4 = vpop.f32.mrf.mxu3 }
 0x332   : > { %v1506_v31 = vadd.f32 %v2210_v40, %v1505_v4 }
 0x334   : > { %1594 = vst.msk [vmem:[%s2215_s29 + $0x180] sm:$0xff] %vm1545_vm3, %v1506_v31 }
 0x339   : > { %v1507_v32 = vpop.f32.mrf.mxu3 }
 0x33a   : > { %v1508_v33 = vadd.f32 %v2210_v40, %v1507_v32 }
 0x33c   : > { %1595 = vst.msk [vmem:[%s2215_s29 + $0x188] sm:$0xff] %vm1545_vm3, %v1508_v33 }
 0x341   : > { %v1510_v34 = vpop.f32.mrf.mxu3 }
 0x342   : > { %v1511_v35 = vadd.f32 %v2210_v40, %v1510_v34 }
 0x344   : > { %1596 = vst.msk [vmem:[%s2215_s29 + $0x190] sm:$0xff] %vm1545_vm3, %v1511_v35 }
 0x349   : > { %v1512_v36 = vpop.f32.mrf.mxu3 }
 0x34a   : > { %v1513_v37 = vadd.f32 %v2210_v40, %v1512_v36 }
 0x34c   : > { %1597 = vst.msk [vmem:[%s2215_s29 + $0x198] sm:$0xff] %vm1545_vm3, %v1513_v37 }
 0x351   : > { %v1515_v38 = vpop.f32.mrf.mxu3 }
 0x352   : > { %v1516_v39 = vadd.f32 %v2210_v40, %v1515_v38 }
 0x354   : > { %1598 = vst.msk [vmem:[%s2215_s29 + $0x1a0] sm:$0xff] %vm1545_vm3, %v1516_v39 }
 0x359   : > { %v1517_v41 = vpop.f32.mrf.mxu3 }
 0x35a   : > { %v1518_v42 = vadd.f32 %v2210_v40, %v1517_v41 }
 0x35c   : > { %1599 = vst.msk [vmem:[%s2215_s29 + $0x1a8] sm:$0xff] %vm1545_vm3, %v1518_v42 }
 0x361   : > { %v1520_v43 = vpop.f32.mrf.mxu3 }
 0x362   : > { %v1521_v44 = vadd.f32 %v2210_v40, %v1520_v43 }
 0x364   : > { %1600 = vst.msk [vmem:[%s2215_s29 + $0x1b0] sm:$0xff] %vm1545_vm3, %v1521_v44 }
 0x369   : > { %v1522_v45 = vpop.f32.mrf.mxu3 }
 0x36a   : > { %v1523_v46 = vadd.f32 %v2210_v40, %v1522_v45 }
 0x36c   : > { %1601 = vst.msk [vmem:[%s2215_s29 + $0x1b8] sm:$0xff] %vm1545_vm3, %v1523_v46 }
 0x371   : > { %v1525_v47 = vpop.f32.mrf.mxu3 }
 0x372   : > { %v1526_v48 = vadd.f32 %v2210_v40, %v1525_v47 }
 0x374   : > { %1602 = vst.msk [vmem:[%s2215_s29 + $0x1c0] sm:$0xff] %vm1545_vm3, %v1526_v48 }
 0x379   : > { %v1527_v49 = vpop.f32.mrf.mxu3 }
 0x37a   : > { %v1528_v50 = vadd.f32 %v2210_v40, %v1527_v49 }
 0x37c   : > { %1603 = vst.msk [vmem:[%s2215_s29 + $0x1c8] sm:$0xff] %vm1545_vm3, %v1528_v50 }
 0x381   : > { %v1530_v51 = vpop.f32.mrf.mxu3 }
 0x382   : > { %v1531_v52 = vadd.f32 %v2210_v40, %v1530_v51 }
 0x384   : > { %1604 = vst.msk [vmem:[%s2215_s29 + $0x1d0] sm:$0xff] %vm1545_vm3, %v1531_v52 }
 0x389   : > { %v1532_v53 = vpop.f32.mrf.mxu3 }
 0x38a   : > { %v1533_v54 = vadd.f32 %v2210_v40, %v1532_v53 }
 0x38c   : > { %1605 = vst.msk [vmem:[%s2215_s29 + $0x1d8] sm:$0xff] %vm1545_vm3, %v1533_v54 }
 0x391   : > { %v1535_v55 = vpop.f32.mrf.mxu3 }
 0x392   : > { %v1536_v56 = vadd.f32 %v2210_v40, %v1535_v55 }
 0x394   : > { %1606 = vst.msk [vmem:[%s2215_s29 + $0x1e0] sm:$0xff] %vm1545_vm3, %v1536_v56 }
 0x399   : > { %v1537_v7 = vpop.f32.mrf.mxu3 }
 0x39a   : > { %v1538_v57 = vadd.f32 %v2210_v40, %v1537_v7 }
 0x39c   : > { %1607 = vst.msk [vmem:[%s2215_s29 + $0x1e8] sm:$0xff] %vm1545_vm3, %v1538_v57 }
 0x3a1   : > { %v1540_v58 = vpop.f32.mrf.mxu3 }
 0x3a2   : > { %v1541_v59 = vadd.f32 %v2210_v40, %v1540_v58 }
 0x3a4   : > { %1608 = vst.msk [vmem:[%s2215_s29 + $0x1f0] sm:$0xff] %vm1545_vm3, %v1541_v59 }
 0x3a9   : > { %v1542_v60 = vpop.f32.mrf.mxu3 }
 0x3aa   : > { %v1543_v61 = vadd.f32 %v2210_v40, %v1542_v60 }
 0x3ac   : > { %1609 = vst.msk [vmem:[%s2215_s29 + $0x1f8] sm:$0xff] %vm1545_vm3, %v1543_v61 }
 0x3ad PF: > { %s17_s24 = sadd.s32 1, %s1977_s24  }
 0x3ae   : > { %p14_p4 = scmp.ge.s32.totalorder %s17_s24, 4  }
 0x3b0   :  { %16 = sbr.rel (!%p14_p4) target bundleno = 1 (0x1), region = 78 }

</bundles_post_ra>
